<compile_context>
chip_gen: v6e
topology: v6e:2x2x1
jax: 0.10.0
libtpu: 0.0.40
codegen_flags: <defaults>
</compile_context>

<pallas_src>
import jax
import jax.numpy as jnp
from jax.experimental import pallas as pl
from jax.experimental.pallas import tpu as pltpu  # noqa: F401  (TPU backend)


def _identity_kernel(in_ref, out_ref):
    # Single tiny VMEM copy (the block is the full (2, 4) array).
    out_ref[...] = in_ref[...]


def _pallas_identity(a):
    """Identity copy of a small array through one un-gridded Pallas call."""
    zero_idx = tuple(0 for _ in a.shape)
    return pl.pallas_call(
        _identity_kernel,
        out_shape=jax.ShapeDtypeStruct(a.shape, a.dtype),
        in_specs=[pl.BlockSpec(a.shape, lambda: zero_idx)],
        out_specs=pl.BlockSpec(a.shape, lambda: zero_idx),
    )(a)


def model_forward(x, y, z):
    """Reproduces Model.forward semantics.

    x: any shape with 8 elements     -> returned as (2, 4)
    y: any shape with 2*N elements   -> returned as (N, 1, 2)
    z: any shape with M elements     -> returned as (M,)
    """
    # x.view(1, 1, 8).reshape(2, -1)  -- metadata only, then routed through the
    # token-sized Pallas identity kernel (fixed 8-element payload).
    x2 = jnp.reshape(jnp.reshape(x, (1, 1, 8)), (2, -1))        # (2, 4)
    x_out = _pallas_identity(x2)

    # y.reshape(-1, x.size(0)).unsqueeze(1) -- x.size(0) == 2 here because x
    # was already reassigned to the (2, 4) view in the PyTorch forward.
    y_out = jnp.reshape(y, (-1, 2))[:, None, :]                  # (N, 1, 2)

    # z.unsqueeze(0).unsqueeze(2).view(-1) == flatten(z)
    z_out = jnp.reshape(z, (-1,))                                # (M,)

    return x_out, y_out, z_out


if __name__ == "__main__":
    key = jax.random.PRNGKey(0)
    kx, ky, kz = jax.random.split(key, 3)
    # Small shapes consistent with the forward's constraints:
    #   x must have 8 elements, y an even number of elements, z anything.
    x = jax.random.normal(kx, (1, 8), dtype=jnp.float32)
    y = jax.random.normal(ky, (2, 6), dtype=jnp.float32)
    z = jax.random.normal(kz, (3, 4), dtype=jnp.float32)

    x_out, y_out, z_out = jax.jit(model_forward)(x, y, z)
    jax.block_until_ready((x_out, y_out, z_out))

    # Reference check (pure-JAX semantics mirroring the PyTorch module).
    x_ref = x.reshape(1, 1, 8).reshape(2, -1)
    y_ref = y.reshape(-1, x_ref.shape[0])[:, None, :]
    z_ref = z[None, :, None, :].reshape(-1)

    assert x_out.shape == (2, 4)
    assert y_out.shape == (6, 1, 2)
    assert z_out.shape == (12,)
    assert jnp.array_equal(x_out, x_ref)
    assert jnp.array_equal(y_out, y_ref)
    assert jnp.array_equal(z_out, z_ref)

    print("KERNEL_OK")
</pallas_src>

<mosaic_0001>
module attributes {stable_mosaic.version = 11 : i64} {
  func.func @_identity_kernel(%arg0: memref<2x4xf32, #tpu.memory_space<vmem>>, %arg1: memref<2x4xf32, #tpu.memory_space<vmem>>) attributes {dimension_semantics = [], scalar_prefetch = 0 : i64, scratch_operands = 0 : i64, tpu.core_type = #tpu.core_type<tc>} {
    %c0 = arith.constant 0 : index
    %c0_0 = arith.constant 0 : index
    %0 = vector.load %arg0[%c0, %c0_0] : memref<2x4xf32, #tpu.memory_space<vmem>>, vector<2x4xf32>
    %c0_1 = arith.constant 0 : index
    %c0_2 = arith.constant 0 : index
    %1 = vector.load %arg1[%c0_1, %c0_2] : memref<2x4xf32, #tpu.memory_space<vmem>>, vector<2x4xf32>
    tpu.vector_store %arg1[%c0_1, %c0_2], %0 {strides = array<i32>} : memref<2x4xf32, #tpu.memory_space<vmem>>, vector<2x4xf32>,
    return
  }
}

</mosaic_0001>

<bundles_post_ra>
// kernel: model_forward.1
= control target key start
LH: loop header
LB: loop body
LE: loop exit
PB: predicated region body
PF: predicated region fallthrough
CT: control target
= control target key end

     0   :  { %vm10_vm0 = vcmask 25600   ;;  %s66_s0 = inlined_call_operand.vmem [shape: f32[2,4], index: 0, kind: input, shape index: {}]   ;;  %s67_s1 = inlined_call_operand.hbm [shape: f32[2,4], index: 1, kind: output, shape index: {}]  }
   0x1   :  { %v9_v0 = vld [vmem:[%s66_s0] sm:$0x3] }
   0x2   :  { %6 = vsyncpa [#allocation3], 0  ;;  %11 = vst.msk [vmem:[#allocation2] sm:$0x3] %vm10_vm0, %v9_v0  ;;  %s49_s8 = smov [#allocation2]  }
   0x3   :  { %s18_s9 = sshll.u32 %s49_s8, 4  ;;  %s19_s9 = int_to_ptr.vmem [resolvable:$true] %s18_s9 }
   0x4   :  { %s27_s10 = scalar_lea.vmem %s19_s9, 32  ;;  %p32_p1 = scmp.lt.s32.totalorder %s19_s9, %s19_s9 }
   0x5   :  { %p28_p0 = scmp.ne.s32.totalorder %s19_s9, %s27_s10  ;;  %p33_p2 = scmp.lt.s32.totalorder %s27_s10, %s27_s10 }
   0x7   :  { %p34_p3 = por %p33_p2, %p32_p1 }
   0x9   :  { %p35_p4 = pnand %p34_p3, %p28_p0 }
   0xb   :  { %38 = shalt.err (!%p35_p4)
}
   0xc   :  { %21 = dma.vmem_to_hbm [thread:$0]  %s19_s9, 32, %s67_s1, [#allocation3]  }
   0xd   :  { %47 = dma.done.wait [#allocation3], 32  }
   0xe   :  { %48 = vsyncadd [#allocation3], 4294967264 }
   0xf   :  { %25 = vsyncpa [#allocation3], 1 }

</bundles_post_ra>
